<compile_context>
chip_gen: v6e
topology: v6e:2x2x1
jax: 0.10.0
libtpu: 0.0.40
codegen_flags: <defaults>
</compile_context>

<pallas_src>
import functools

import jax
import jax.numpy as jnp
from jax.experimental import pallas as pl
from jax.experimental.pallas import tpu as pltpu

EPS = 1e-6  # nn.LayerNorm(eps=1e-6) from the module default norm_layer


def _layernorm(x, gamma, beta):
    """LayerNorm over the last axis (biased variance, like torch)."""
    mean = jnp.mean(x, axis=-1, keepdims=True)
    xc = x - mean
    var = jnp.mean(xc * xc, axis=-1, keepdims=True)
    return xc * jax.lax.rsqrt(var + EPS) * gamma + beta


# ---------------------------------------------------------------------------
# Pallas kernels
# ---------------------------------------------------------------------------
def _patch_embed_kernel(p_ref, w_ref, b_ref, o_ref):
    # p_ref: (1, tt, C*p*p) bf16, w_ref: (C*p*p, D) bf16, b_ref: (1, D) f32
    o_ref[0] = (
        jnp.dot(p_ref[0], w_ref[...], preferred_element_type=jnp.float32)
        + b_ref[...]
    )


def _fused_blocks_kernel(
    tok_ref, poscls_ref,
    g1_ref, b1_ref, wqkv_ref, bqkv_ref, wproj_ref, bproj_ref,
    g2_ref, b2_ref, w1_ref, bb1_ref, w2_ref, bb2_ref,
    ng_ref, nb_ref, hw_ref, hb_ref,
    logits_ref,
    act_ref,
    *, num_heads, head_dim, num_tokens, seq_real,
):
    """All ViT blocks + final norm + head fused.

    grid = (batch_tiles, depth); the activation for the current batch tile is
    resident in act_ref across the depth axis, so per-layer weights are DMA'd
    once per batch tile (once total when batch_tile == B).
    """
    l = pl.program_id(1)
    H, hd = num_heads, head_dim
    D = H * hd
    Bt, S_pad, _ = act_ref.shape
    T = num_tokens
    R = Bt * S_pad  # flattened row count for qkv / proj / MLP matmuls

    # ---- layer 0: residual stream = [cls + pos0 | tokens + pos | 0-pad] ----
    @pl.when(l == 0)
    def _():
        act_ref[:, 0:1, :] = jnp.broadcast_to(
            poscls_ref[0:1, :].reshape(1, 1, D), (Bt, 1, D))
        act_ref[:, 1:T + 1, :] = tok_ref[...] + poscls_ref[1:T + 1, :][None, :, :]
        if S_pad > T + 1:
            act_ref[:, T + 1:, :] = jnp.zeros(
                (Bt, S_pad - T - 1, D), jnp.float32)

    x = act_ref[...]                                   # (Bt, S_pad, D) f32
    x2 = x.reshape(R, D)                               # tile-aligned (S_pad%8==0)

    # --- attention branch: x += Proj(MHSA(LN1(x))) ---
    h = _layernorm(x2, g1_ref[0], b1_ref[0])
    qkv = jnp.dot(h.astype(jnp.bfloat16), wqkv_ref[0],
                  preferred_element_type=jnp.float32) + bqkv_ref[0]  # (R, 3D)
    qkv3 = qkv.reshape(Bt, S_pad, 3 * D)
    wproj = wproj_ref[0]                               # (D, D) bf16

    # Mask padded key columns (static no-op when there is no padding).
    if S_pad > seq_real:
        kidx = jax.lax.broadcasted_iota(jnp.int32, (1, 1, S_pad), 2)
        key_bias = jnp.where(kidx < seq_real, 0.0, -1e30).astype(jnp.float32)
    else:
        key_bias = None

    # Per-head loop: aligned lane slices feed batched einsums directly; the
    # output projection is accumulated per head (no head concat is built).
    # NOTE: the 1/sqrt(hd) scale is already folded into wqkv/bqkv (wrapper).
    attn = None
    for hh in range(H):
        q_h = qkv3[:, :, hh * hd:(hh + 1) * hd].astype(jnp.bfloat16)
        k_h = qkv3[:, :, D + hh * hd:D + (hh + 1) * hd].astype(jnp.bfloat16)
        v_h = qkv3[:, :, 2 * D + hh * hd:2 * D + (hh + 1) * hd].astype(jnp.bfloat16)
        s = jnp.einsum("bqd,bkd->bqk", q_h, k_h,
                       preferred_element_type=jnp.float32)      # (Bt, S, S)
        if key_bias is not None:
            s = s + key_bias
        s = s - jnp.max(s, axis=-1, keepdims=True)
        p = jnp.exp(s)
        p = p * pl.reciprocal(jnp.sum(p, axis=-1, keepdims=True), approx=True)
        ctx = jnp.einsum("bqk,bkd->bqd", p.astype(jnp.bfloat16), v_h,
                         preferred_element_type=jnp.float32)    # (Bt, S, hd)
        part = jnp.dot(ctx.reshape(R, hd).astype(jnp.bfloat16),
                       wproj[hh * hd:(hh + 1) * hd, :],
                       preferred_element_type=jnp.float32)      # (R, D)
        attn = part if attn is None else attn + part
    x2 = x2 + attn + bproj_ref[0]

    # --- MLP branch: x += W2(GELU(W1(LN2(x)))) ---
    h2 = _layernorm(x2, g2_ref[0], b2_ref[0])
    m = jnp.dot(h2.astype(jnp.bfloat16), w1_ref[0],
                preferred_element_type=jnp.float32) + bb1_ref[0]
    # exact GELU (torch nn.GELU default); tanh approx would ride the EUP slot
    # but is kept exact here for parity with the reference module.
    m = 0.5 * m * (1.0 + jax.lax.erf(m * (2.0 ** -0.5)))
    m = jnp.dot(m.astype(jnp.bfloat16), w2_ref[0],
                preferred_element_type=jnp.float32) + bb2_ref[0]
    x2 = x2 + m
    act_ref[...] = x2.reshape(Bt, S_pad, D)

    # ---- last layer: fused final LayerNorm (cls rows) + classifier head ----
    @pl.when(l == pl.num_programs(1) - 1)
    def _():
        x3 = x2.reshape(Bt, S_pad, D)
        rows = []
        for b in range(Bt):                           # Bt is small & static
            cls_b = x3[b, 0:1, :]                     # (1, D)
            hc = _layernorm(cls_b, ng_ref[...], nb_ref[...])
            rows.append(jnp.dot(hc, hw_ref[...],
                                preferred_element_type=jnp.float32)
                        + hb_ref[...])
        logits_ref[...] = jnp.concatenate(rows, axis=0)


# ---------------------------------------------------------------------------
# Forward wrapper
# ---------------------------------------------------------------------------
def _token_tile(T, max_tile=512):
    """Pick a token-tile size (multiple of 8 dividing T) to bound VMEM."""
    if T <= max_tile:
        return T
    for tt in range(max_tile - max_tile % 8, 7, -8):
        if T % tt == 0:
            return tt
    return T


def _vmem_limit_bytes():
    """Derive a safe VMEM request from the actual chip (v7x has only 64 MiB)."""
    try:
        cap = int(pltpu.get_tpu_info().vmem_capacity_bytes)
    except Exception:
        cap = 64 * 1024 * 1024
    return min(int(cap * 0.85), 112 * 1024 * 1024)


def vit_forward(x, ids, params, *, patch_size, num_heads, batch_tile=None):
    B, N, C, H, W = x.shape
    p = patch_size
    gh, gw = H // p, W // p
    T = N * gh * gw                                   # number of patch tokens
    D = params["pos_embed"].shape[-1]
    assert D % num_heads == 0
    head_dim = D // num_heads
    P = C * p * p

    # --- glue: patchify (Conv2d kernel=stride=patch_size == per-patch matmul),
    # produced directly in bf16 (the transpose materializes anyway).
    patches = (
        x.reshape(B, N, C, gh, p, gw, p)
         .transpose(0, 1, 3, 5, 2, 4, 6)              # (B, N, gh, gw, C, p, p)
         .reshape(B, T, P)
         .astype(jnp.bfloat16)
    )

    # --- Pallas: patch embedding projection, tiled over tokens
    tt = _token_tile(T)
    tokens = pl.pallas_call(
        _patch_embed_kernel,
        out_shape=jax.ShapeDtypeStruct((B, T, D), jnp.float32),
        grid=(B, T // tt),
        in_specs=[
            pl.BlockSpec((1, tt, P), lambda b, t: (b, t, 0)),
            pl.BlockSpec((P, D), lambda b, t: (0, 0)),
            pl.BlockSpec((1, D), lambda b, t: (0, 0)),
        ],
        out_specs=pl.BlockSpec((1, tt, D), lambda b, t: (b, t, 0)),
        compiler_params=pltpu.CompilerParams(
            dimension_semantics=("parallel", "parallel")),
    )(patches, params["patch_w"], params["patch_b"])

    # --- glue (parameter-sized only): gathered pos rows, cls folded into row 0,
    # padded to a sublane multiple.  The activation itself never leaves Pallas.
    ids_arr = jnp.asarray(ids, jnp.int32)
    assert ids_arr.shape[0] == T, (ids_arr.shape, T)
    ids_full = jnp.concatenate([jnp.zeros((1,), jnp.int32), ids_arr + 1])
    pos = params["pos_embed"][0, ids_full]            # (T+1, D)
    pos = pos.at[0].add(params["cls_token"][0, 0])    # row 0 = cls + pos[0]
    S_real = T + 1
    S_pad = ((S_real + 7) // 8) * 8
    poscls = jnp.pad(pos, ((0, S_pad - S_real), (0, 0)))

    blocks = params["blocks"]
    depth = blocks["wqkv"].shape[0]

    # Fold 1/sqrt(head_dim) into the q portion of wqkv/bqkv (weight prep; in a
    # real deployment this happens once at weight-load time).
    scale = head_dim ** -0.5
    scale_vec = jnp.concatenate([jnp.full((D,), scale, jnp.float32),
                                 jnp.ones((2 * D,), jnp.float32)])
    wqkv = (blocks["wqkv"].astype(jnp.float32) * scale_vec).astype(jnp.bfloat16)
    bqkv = blocks["bqkv"] * scale_vec

    weights = (blocks["g1"], blocks["b1"], wqkv, bqkv,
               blocks["wproj"], blocks["bproj"],
               blocks["g2"], blocks["b2"],
               blocks["w1"], blocks["bb1"], blocks["w2"], blocks["bb2"])

    bt = B if batch_tile is None else batch_tile
    assert B % bt == 0
    nc = params["head_w"].shape[1]

    def _wspec(arr):  # stacked (depth, r, c) weight -> per-layer (1, r, c) block
        return pl.BlockSpec((1,) + arr.shape[1:], lambda bb, l: (l, 0, 0))

    def _resident2(arr):  # small 2-D param, resident across the whole grid
        return pl.BlockSpec(arr.shape, lambda bb, l: (0, 0))

    kernel = functools.partial(
        _fused_blocks_kernel,
        num_heads=num_heads, head_dim=head_dim,
        num_tokens=T, seq_real=S_real)

    logits = pl.pallas_call(
        kernel,
        out_shape=jax.ShapeDtypeStruct((B, nc), jnp.float32),
        grid_spec=pltpu.PrefetchScalarGridSpec(
            num_scalar_prefetch=0,
            grid=(B // bt, depth),
            in_specs=[pl.BlockSpec((bt, T, D), lambda bb, l: (bb, 0, 0)),
                      pl.BlockSpec((S_pad, D), lambda bb, l: (0, 0))]
                     + [_wspec(a) for a in weights]
                     + [_resident2(params["norm_g"]),
                        _resident2(params["norm_b"]),
                        _resident2(params["head_w"]),
                        _resident2(params["head_b"])],
            out_specs=pl.BlockSpec((bt, nc), lambda bb, l: (bb, 0)),
            scratch_shapes=[pltpu.VMEM((bt, S_pad, D), jnp.float32)],
        ),
        compiler_params=pltpu.CompilerParams(
            dimension_semantics=("parallel", "arbitrary"),
            vmem_limit_bytes=_vmem_limit_bytes(),
        ),
    )(tokens, poscls, *weights,
      params["norm_g"], params["norm_b"], params["head_w"], params["head_b"])
    return logits


# ---------------------------------------------------------------------------
# Deterministic synthetic parameters (shapes follow the module's __init__);
# per-block weights are stacked along a leading depth axis for the fused call.
# ---------------------------------------------------------------------------
def init_params(key, *, patch_size, in_chans, embed_dim, depth, mlp_ratio,
                num_classes, num_patches):
    D = embed_dim
    P = in_chans * patch_size * patch_size
    Hm = int(D * mlp_ratio)
    keys = jax.random.split(key, 8)

    def nrm(k, shape, std=0.02):
        return jax.random.normal(k, shape, jnp.float32) * std

    return {
        # Conv2d(in_chans, D, p, p) weight (D, C, p, p) flattened to (C*p*p, D)
        "patch_w": nrm(keys[0], (P, D)).astype(jnp.bfloat16),
        "patch_b": jnp.zeros((1, D), jnp.float32),
        "cls_token": nrm(keys[1], (1, 1, D), 1e-6),
        "pos_embed": nrm(keys[2], (1, num_patches + 1, D), 0.02),
        "norm_g": jnp.ones((1, D), jnp.float32),
        "norm_b": jnp.zeros((1, D), jnp.float32),
        "head_w": nrm(keys[3], (D, num_classes)),
        "head_b": jnp.zeros((1, num_classes), jnp.float32),
        "blocks": {
            "g1": jnp.ones((depth, 1, D), jnp.float32),
            "b1": jnp.zeros((depth, 1, D), jnp.float32),
            "wqkv": nrm(keys[4], (depth, D, 3 * D)).astype(jnp.bfloat16),
            "bqkv": jnp.zeros((depth, 1, 3 * D), jnp.float32),
            "wproj": nrm(keys[5], (depth, D, D)).astype(jnp.bfloat16),
            "bproj": jnp.zeros((depth, 1, D), jnp.float32),
            "g2": jnp.ones((depth, 1, D), jnp.float32),
            "b2": jnp.zeros((depth, 1, D), jnp.float32),
            "w1": nrm(keys[6], (depth, D, Hm)).astype(jnp.bfloat16),
            "bb1": jnp.zeros((depth, 1, Hm), jnp.float32),
            "w2": nrm(keys[7], (depth, Hm, D)).astype(jnp.bfloat16),
            "bb2": jnp.zeros((depth, 1, D), jnp.float32),
        },
    }


if __name__ == "__main__":
    # Small lane-friendly config consistent with the module's forward:
    #   x: (B, N, C, H, W) -> N images per sample, patchified together.
    B, N, C, H, W = 2, 2, 3, 16, 16
    patch_size = 8
    embed_dim = 256       # multiple of 128 lanes
    depth = 2
    num_heads = 2         # head_dim = 128 keeps head slices lane-tile aligned
    mlp_ratio = 4.0
    num_classes = 10

    gh, gw = H // patch_size, W // patch_size
    num_patches = gh * gw                 # per-image patches (pos_embed len-1)

    key = jax.random.PRNGKey(0)
    k_x, k_p = jax.random.split(key)
    x = jax.random.normal(k_x, (B, N, C, H, W), jnp.float32)
    # ids: per patch token, the index into the (single-image) pos_embed grid.
    ids = [0, 1, 2, 3, 0, 1, 2, 3]        # len == N * gh * gw

    params = init_params(
        k_p,
        patch_size=patch_size,
        in_chans=C,
        embed_dim=embed_dim,
        depth=depth,
        mlp_ratio=mlp_ratio,
        num_classes=num_classes,
        num_patches=num_patches,
    )

    logits = vit_forward(x, ids, params,
                         patch_size=patch_size, num_heads=num_heads)
    jax.block_until_ready(logits)
    assert logits.shape == (B, num_classes), logits.shape
    assert bool(jnp.all(jnp.isfinite(logits))), "non-finite logits"
    print("KERNEL_OK")
</pallas_src>

<mosaic_0001>
module attributes {stable_mosaic.version = 11 : i64} {
  func.func @_patch_embed_kernel(%arg0: i32, %arg1: i32, %arg2: memref<1x8x192xbf16, #tpu.memory_space<vmem>>, %arg3: memref<192x256xbf16, #tpu.memory_space<vmem>>, %arg4: memref<1x256xf32, #tpu.memory_space<vmem>>, %arg5: memref<1x8x256xf32, #tpu.memory_space<vmem>>) attributes {dimension_semantics = [#tpu.dimension_semantics<parallel>, #tpu.dimension_semantics<parallel>], iteration_bounds = array<i64: 2, 1>, scalar_prefetch = 0 : i64, scratch_operands = 0 : i64, tpu.core_type = #tpu.core_type<tc>, window_params = [{transform_indices = @transform_0, window_bounds = array<i64: 1, 8, 192>}, {pipeline_mode = #tpu.pipeline_mode<synchronous>, transform_indices = @transform_1, window_bounds = array<i64: 192, 256>}, {pipeline_mode = #tpu.pipeline_mode<synchronous>, transform_indices = @transform_2, window_bounds = array<i64: 1, 256>}, {transform_indices = @transform_3, window_bounds = array<i64: 1, 8, 256>}]} {
    %c0 = arith.constant 0 : index
    %c0_0 = arith.constant 0 : index
    %c0_1 = arith.constant 0 : index
    %0 = vector.load %arg2[%c0, %c0_0, %c0_1] : memref<1x8x192xbf16, #tpu.memory_space<vmem>>, vector<1x8x192xbf16>
    %1 = vector.shape_cast %0 : vector<1x8x192xbf16> to vector<8x192xbf16>
    %c0_2 = arith.constant 0 : index
    %c0_3 = arith.constant 0 : index
    %2 = vector.load %arg3[%c0_2, %c0_3] : memref<192x256xbf16, #tpu.memory_space<vmem>>, vector<192x256xbf16>
    %cst = arith.constant dense<0.000000e+00> : vector<8x256xf32>
    %3 = tpu.matmul %1, %2, %cst {dimension_numbers = #tpu.dot_dimension_numbers<[1], [0], [0], [1], [0, 0, 1, 1], [], []>} : vector<8x192xbf16>, vector<192x256xbf16>, vector<8x256xf32> -> vector<8x256xf32>
    %c0_4 = arith.constant 0 : index
    %c0_5 = arith.constant 0 : index
    %4 = vector.load %arg4[%c0_4, %c0_5] : memref<1x256xf32, #tpu.memory_space<vmem>>, vector<1x256xf32>
    %5 = vector.broadcast %4 : vector<1x256xf32> to vector<8x256xf32>
    %6 = arith.addf %3, %5 : vector<8x256xf32>
    %c0_6 = arith.constant 0 : index
    %c0_7 = arith.constant 0 : index
    %c0_8 = arith.constant 0 : index
    %7 = vector.load %arg5[%c0_6, %c0_7, %c0_8] : memref<1x8x256xf32, #tpu.memory_space<vmem>>, vector<1x8x256xf32>
    %8 = vector.shape_cast %7 : vector<1x8x256xf32> to vector<8x256xf32>
    %9 = vector.shape_cast %6 : vector<8x256xf32> to vector<1x8x256xf32>
    tpu.vector_store %arg5[%c0_6, %c0_7, %c0_8], %9 {strides = array<i32>} : memref<1x8x256xf32, #tpu.memory_space<vmem>>, vector<1x8x256xf32>,
    return
  }
  func.func @transform_0(%arg0: i32, %arg1: i32) -> (i32, i32, i32) {
    %c0_i32 = arith.constant 0 : i32
    %c0_i32_0 = arith.constant 0 : i32
    return %arg0, %arg1, %c0_i32 : i32, i32, i32
  }
  func.func @transform_1(%arg0: i32, %arg1: i32) -> (i32, i32) {
    %c0_i32 = arith.constant 0 : i32
    %c0_i32_0 = arith.constant 0 : i32
    %c0_i32_1 = arith.constant 0 : i32
    return %c0_i32, %c0_i32_0 : i32, i32
  }
  func.func @transform_2(%arg0: i32, %arg1: i32) -> (i32, i32) {
    %c0_i32 = arith.constant 0 : i32
    %c0_i32_0 = arith.constant 0 : i32
    %c0_i32_1 = arith.constant 0 : i32
    return %c0_i32, %c0_i32_0 : i32, i32
  }
  func.func @transform_3(%arg0: i32, %arg1: i32) -> (i32, i32, i32) {
    %c0_i32 = arith.constant 0 : i32
    %c0_i32_0 = arith.constant 0 : i32
    return %arg0, %arg1, %c0_i32 : i32, i32, i32
  }
}

</mosaic_0001>

<bundles_post_ra>
// kernel: tpu_custom_call.1
= control target key start
LH: loop header
LB: loop body
LE: loop exit
PB: predicated region body
PF: predicated region fallthrough
CT: control target
= control target key end

     0   :  { %8 = vsyncpa [#allocation3], 0  ;;  %s1049_s0 = inlined_call_operand.hbm [shape: bf16[2,8,192], index: 0, kind: input, shape index: {}]   ;;  %s1050_s1 = inlined_call_operand.hbm [shape: bf16[192,256], index: 1, kind: input, shape index: {}]   ;;  %s1051_s2 = inlined_call_operand.vmem [shape: f32[1,256], index: 2, kind: input, shape index: {}]   ;;  %s1052_s3 = inlined_call_operand.hbm [shape: f32[2,8,256], index: 3, kind: output, shape index: {}]  }
   0x1   :  { %10 = vsyncpa [#allocation3 + $0x1], 0 }
   0x2   :  { %11 = vsyncpa [#allocation6], 0 }
   0x3   :  { %12 = vsyncpa [#allocation4], 0 }
   0x4   :  { %14 = vsyncpa [#allocation4 + $0x1], 0  ;;  %s866_s12 = smov 0   ;;  %s868_s13 = smov 0  }
   0x5   :  { %s870_s14 = smov 0   ;;  %s872_s15 = smov 0  }
   0x6   :  { %s874_s16 = smov 0   ;;  %s876_s17 = smov 0  }
   0x7 LB: > { %s542_s18 = sadd.s32 4294967295, %s839_s17   ;;  %s543_s19 = sadd.s32 4294967294, %s839_s17   ;;  %s839_s17 = sphi %s876_s17, %s20_s17   ;;  %s835_s16 = sphi %s874_s16, %s1070_s16   ;;  %s831_s15 = sphi %s872_s15, %s1069_s15   ;;  %s827_s14 = sphi %s870_s14, %s1068_s14   ;;  %s823_s13 = sphi %s868_s13, %s1067_s13   ;;  %s819_s12 = sphi %s866_s12, %s1066_s12  }
   0x8   : > { %p54_p0 = scmp.ne.s32.totalorder %s823_s13, %s819_s12  ;;  %p900_p1 = scmp.eq.s32.totalorder %s542_s18, 0 }
   0x9   : > { %p904_p2 = scmp.eq.s32.totalorder %s542_s18, 1  ;;  %p128_p3 = scmp.eq.s32.totalorder %s543_s19, 1 }
   0xa   : > { %p910_p4 = por %p900_p1, %p54_p0  ;;  %p544_p5 = scmp.ge.s32.totalorder %s839_s17, 1 }
   0xb   : > { %p915_p6 = por %p128_p3, %p54_p0  ;;  %p135_p7 = scmp.lt.s32.totalorder %s839_s17, 3 }
   0xc   : > { %s1056_s22 = scalar_select %p910_p4, 1, 0 }
   0xd   : > { %s1057_s23 = scalar_select %p915_p6, 1, 0 }
   0xe   : > { %p920_p8 = pnand %p544_p5, %p135_p7  ;;  %s841_s25 = smov [#allocation5]  }
   0xf   : > { %s147_s26 = sshll.u32 %s841_s25, 4  ;;  %s32_s28 = sadd.s32 1, %s835_s16  ;;  %s148_s26 = int_to_ptr.vmem [resolvable:$true] %s147_s26 }
  0x10   : > { %p596_p9 = pneg %p920_p8  ;;  %s712_s29 = scalar_lea.vmem %s148_s26, 3072 }
  0x11   : > { %p713_p13 = scmp.ne.s32.totalorder %s148_s26, %s712_s29  ;;  %p720_p5 = scmp.lt.s32.totalorder %s148_s26, %s148_s26 }
  0x12   : > { %p929_p11 = pnand %p596_p9, %p900_p1  ;;  %p721_p7 = scmp.lt.s32.totalorder %s712_s29, %s712_s29 }
  0x14   : > { %p703_p12 = pneg %p929_p11  ;;  %p722_p6 = por %p721_p7, %p720_p5 }
  0x16   : > { %p715_p0 = pnand %p713_p13, %p703_p12 }
  0x18   : > { %p716_p3 = pneg %p715_p0 }
  0x1a   : > { %p723_p4 = pnand %p722_p6, %p716_p3 }
  0x1c   : > { %726 = shalt.err (!%p723_p4)
}
  0x1d   : > { %s842_s30 = smov 128   ;;  %s843_s4 = smov 8  }
  0x1e   : > { %599 = dma.hbm_to_vmem [thread:$0]  (!%p929_p11), %s1050_s1, 3072, %s148_s26, [#allocation6], %s842_s30, %s842_s30, %s843_s4  }
  0x1f   : > { %p34_p6 = scmp.ge.s32.totalorder %s32_s28, 2  ;;  %s41_s7 = sadd.s32 1, %s827_s14 }
  0x20   : > { %p48_p4 = scmp.ne.s32.totalorder %s827_s14, %s823_s13  ;;  %p49_p9 = scmp.eq.s32.totalorder %s839_s17, 0 }
  0x21   : > { %s1072_s28 = smov (%p34_p6, %s32_s28), 0  ;;  %p609_p0 = scmp.lt.s32.totalorder %s839_s17, 2 }
  0x22   : > { %p947_p12 = por %p49_p9, %p48_p4  ;;  %p953_p13 = por %p904_p2, %p48_p4 }
  0x23   : > { %s36_s10 = ssub.s32 %s835_s16, %s1072_s28  ;;  %s164_s11 = sand.u32 1, %s827_s14  }
  0x24   : > { %p39_p11 = scmp.eq.s32.totalorder %s36_s10, 0  ;;  %s547_s18 = sshll.u32 %s164_s11, 3 }
  0x25   : > { %s586_s25 = sshll.u32 %s835_s16, 7  ;;  %s168_s30 = scalar_lea.vmem [#allocation2], %s547_s18 }
  0x26   : > { %s962_s19 = scalar_select %p39_p11, %s827_s14, %s41_s7  }
  0x27   : > { %s176_s29 = scalar_lea.hbm %s1049_s0, %s586_s25  ;;  %s178_s4 = sshll.u32 %s168_s30, 4  ;;  %s179_s4 = int_to_ptr.vmem [resolvable:$true] %s178_s4 }
  0x28   : > { %p970_p2 = pnand %p609_p0, %p947_p12  ;;  %s165_s5 = scalar_lea.sflag [#allocation3], %s164_s11 }
  0x29   : > { %s740_s6 = scalar_lea.vmem %s179_s4, 128  ;;  %s844_s7 = smov [#allocation2]  }
  0x2a   : > { %p729_p3 = pneg %p970_p2  ;;  %p741_p5 = scmp.ne.s32.totalorder %s179_s4, %s740_s6 }
  0x2b   : > { %s745_s10 = sshll.u32 %s844_s7, 4  ;;  %s746_s10 = int_to_ptr.vmem [resolvable:$false] %s745_s10 }
  0x2c   : > { %p743_p7 = pnand %p741_p5, %p729_p3  ;;  %s747_s25 = scalar_lea.vmem %s746_s10, 256 }
  0x2d   : > { %p748_p4 = scmp.lt.s32.totalorder %s179_s4, %s746_s10  ;;  %p749_p9 = scmp.lt.s32.totalorder %s747_s25, %s740_s6 }
  0x2e   : > { %p744_p6 = pneg %p743_p7 }
  0x2f   : > { %p750_p11 = por %p749_p9, %p748_p4 }
  0x31   : > { %p751_p10 = pnand %p750_p11, %p744_p6 }
  0x33   : > { %754 = shalt.err (!%p751_p10)
}
  0x34   : > { %603 = dma.hbm_to_vmem [thread:$0]  (!%p970_p2), %s176_s29, 128, %s179_s4, %s165_s5  }
  0x35   : > { %187 = sbr.rel (%p920_p8) target bundleno = 321 (0x141), region = 32  ;;  %s981_s8 = sand.u32 (!%p920_p8), 1, %s823_s13  }
  0x36   : > { %s551_s11 = sshll.u32 (!%p920_p8), %s981_s8, 3  ;;  %s190_s18 = scalar_lea.sflag (!%p920_p8), [#allocation3], %s981_s8 }
  0x37   : > { %s193_s26 = scalar_lea.vmem (!%p920_p8), [#allocation2], %s551_s11  ;;  %p1063_p12 = scmp.ne.s32.totalorder (!%p920_p8), %s1056_s22, 0 }
  0x3a   : > { %806 = dma.done.wait (%p1063_p12), %s190_s18, 128  }
  0x3b   : > { %808 = vsyncadd (%p1063_p12), %s190_s18, 4294967168 }
  0x3c   : > { %810 = dma.done.wait (%p900_p1), [#allocation6], 3072  }
  0x3d   : > { %812 = vsyncadd (%p900_p1), [#allocation6], 4294964224  ;;  %v663_v0 = vld [vmem:[#allocation5 + $0x74] ss:$8 sps:$4 sm:$0xff]   ;;  %v665_v1 = vld [vmem:[#allocation5 + $0x70] ss:$8 sps:$4 sm:$0xff]   ;;  %v248_v27 = vlaneseq }
  0x3e   : > { %388 = vmatprep.subr.bf16.mxu0 %v663_v0  ;;  %v666_v2 = vld [vmem:[#allocation5 + $0x64] ss:$8 sps:$4 sm:$0xff]   ;;  %v668_v3 = vld [vmem:[#allocation5 + $0x60] ss:$8 sps:$4 sm:$0xff]   ;;  %v669_v4 = vld [vmem:[#allocation5 + $0x54] ss:$8 sps:$4 sm:$0xff]  }
  0x3f   : > { %389 = vmatpush1.bf16.msra.mxu0 %v665_v1  ;;  %v671_v5 = vld [vmem:[#allocation5 + $0x50] ss:$8 sps:$4 sm:$0xff]   ;;  %v672_v6 = vld [vmem:[#allocation5 + $0x44] ss:$8 sps:$4 sm:$0xff]   ;;  %v674_v7 = vld [vmem:[#allocation5 + $0x40] ss:$8 sps:$4 sm:$0xff]  }
  0x40   : > { %390 = vmatprep.subr.bf16.mxu0 %v666_v2  ;;  %v675_v8 = vld [vmem:[#allocation5 + $0x34] ss:$8 sps:$4 sm:$0xff]   ;;  %v677_v9 = vld [vmem:[#allocation5 + $0x30] ss:$8 sps:$4 sm:$0xff]   ;;  %v678_v10 = vld [vmem:[#allocation5 + $0x24] ss:$8 sps:$4 sm:$0xff]  }
  0x41   : > { %v221_v11 = vld [vmem:[%s193_s26] sm:$0xff]  ;;  %vm384_vm0 = vcmask 523264   ;;  %v680_v13 = vld [vmem:[#allocation5 + $0x20] ss:$8 sps:$4 sm:$0xff]   ;;  %v684_v16 = vld [vmem:[#allocation5 + $0x4] ss:$8 sps:$4 sm:$0xff]  }
  0x42   : > { %v555_v12 = vcombine.high %v221_v11, %v221_v11  ;;  %v681_v14 = vld [vmem:[#allocation5 + $0x14] ss:$8 sps:$4 sm:$0xff]   ;;  %v683_v15 = vld [vmem:[#allocation5 + $0x10] ss:$8 sps:$4 sm:$0xff]   ;;  %v686_v17 = vld [vmem:[#allocation5] ss:$8 sps:$4 sm:$0xff]   ;;  %v554_v26 = vcombine.low %v221_v11, %v221_v11 }
  0x43   : > { %391 = vmatpush1.bf16.msra.mxu0 %v668_v3  ;;  %v687_v18 = vld [vmem:[#allocation5 + $0xb4] ss:$8 sps:$4 sm:$0xff]   ;;  %v689_v19 = vld [vmem:[#allocation5 + $0xb0] ss:$8 sps:$4 sm:$0xff]   ;;  %v690_v20 = vld [vmem:[#allocation5 + $0xa4] ss:$8 sps:$4 sm:$0xff]  }
  0x44   : > { %392 = vmatprep.subr.bf16.mxu0 %v669_v4  ;;  %580 = vmatprep.mubr.msk.bf16.mxu0 %vm384_vm0, %v555_v12  ;;  %v692_v21 = vld [vmem:[#allocation5 + $0xa0] ss:$8 sps:$4 sm:$0xff]   ;;  %v693_v22 = vld [vmem:[#allocation5 + $0x94] ss:$8 sps:$4 sm:$0xff]   ;;  %v695_v23 = vld [vmem:[#allocation5 + $0x90] ss:$8 sps:$4 sm:$0xff]  }
  0x45   : > { %v696_v24 = vld [vmem:[#allocation5 + $0x84] ss:$8 sps:$4 sm:$0xff]   ;;  %v698_v25 = vld [vmem:[#allocation5 + $0x80] ss:$8 sps:$4 sm:$0xff]   ;;  %v249_v28 = vshrl.u32 %v248_v27, 7  ;;  %s553_s20 = sshll.u32 %s981_s8, 4 }
  0x46   : > { %v246_v30 = vld [vmem:[%s1051_s2] sm:$0x3]  ;;  %s587_s27 = sshll.u32 %s831_s15, 8  ;;  %s219_s29 = scalar_lea.vmem [#allocation7], %s553_s20 }
  0x47   : > { %393 = vmatpush1.bf16.msra.mxu0 %v671_v5  ;;  %v250_v29 = vsub.s32 0, %v249_v28  ;;  %v254_v31 = vsub.s32 1, %v249_v28  ;;  %s448_s30 = sshll.u32 %s219_s29, 4  ;;  %s1001_s5 = scalar_lea.hbm %s1052_s3, %s587_s27  ;;  %s1003_s30 = int_to_ptr.vmem [resolvable:$true] %s448_s30 }
  0x48   : > { %394 = vmatprep.subr.bf16.mxu0 %v672_v6  ;;  %s432_s15 = scalar_lea.sflag [#allocation4], %s981_s8  ;;  %s755_s6 = scalar_lea.vmem %s1003_s30, 256 }
  0x49   : > { %v251_v32 = vrot.slane %v246_v30, %v250_v29  ;;  %v255_v33 = vrot.slane %v246_v30, %v254_v31  ;;  %p756_p1 = scmp.ne.s32.totalorder %s1003_s30, %s755_s6  ;;  %s845_s7 = smov [#allocation7]  }
  0x4a   : > { %s759_s10 = sshll.u32 %s845_s7, 4  ;;  %s760_s10 = int_to_ptr.vmem [resolvable:$false] %s759_s10 }
  0x4b   : > { %395 = vmatpush1.bf16.msra.mxu0 %v674_v7  ;;  %p757_p8 = pnand %p756_p1, %p953_p13  ;;  %s761_s25 = scalar_lea.vmem %s760_s10, 512 }
  0x4c   : > { %396 = vmatprep.subr.bf16.mxu0 %v675_v8  ;;  %p762_p0 = scmp.lt.s32.totalorder %s1003_s30, %s760_s10  ;;  %p763_p2 = scmp.lt.s32.totalorder %s761_s25, %s755_s6 }
  0x4d   : > { %p758_p10 = pneg %p757_p8 }
  0x4e   : > { %p764_p3 = por %p763_p2, %p762_p0 }
  0x4f   : > { %397 = vmatpush1.bf16.msra.mxu0 %v677_v9 }
  0x50   : > { %398 = vmatprep.subr.bf16.mxu0 %v678_v10  ;;  %p765_p5 = pnand %p764_p3, %p758_p10 }
  0x53   : > { %399 = vmatpush1.bf16.msra.mxu0 %v680_v13 }
  0x54   : > { %400 = vmatprep.subr.bf16.mxu0 %v681_v14 }
  0x57   : > { %401 = vmatpush1.bf16.msra.mxu0 %v683_v15 }
  0x58   : > { %402 = vmatprep.subr.bf16.mxu0 %v684_v16 }
  0x5b   : > { %403 = vmatpush1.bf16.msra.mxu0 %v686_v17 }
  0x5c   : > { %412 = vmatprep.subr.bf16.mxu0 %v687_v18 }
  0x5f   : > { %413 = vmatpush2.bf16.msra.mxu0 %v689_v19 }
  0x60   : > { %414 = vmatprep.subr.bf16.mxu0 %v690_v20 }
  0x63   : > { %415 = vmatpush2.bf16.msra.mxu0 %v692_v21 }
  0x64   : > { %416 = vmatprep.subr.bf16.mxu0 %v693_v22 }
  0x67   : > { %417 = vmatpush2.bf16.msra.mxu0 %v695_v23 }
  0x68   : > { %418 = vmatprep.subr.bf16.mxu0 %v696_v24 }
  0x6b   : > { %419 = vmatpush2.bf16.msra.mxu0 %v698_v25 }
  0x6e   : > { %421 = vmatmul.mubr.bf16.vlgmr.msra.gmra.mxu0 %v554_v26 }
 0x12e   : > { %v422_v34 = vpop.f32.mrf.mxu0 }
 0x12f   : > { %v423_v35 = vadd.f32 %v422_v34, %v251_v32 }
 0x130   : > { %v424_v36 = vpop.f32.mrf.mxu0 }
 0x131   : > { %429 = vst [vmem:[%s219_s29] sm:$0xff] %v423_v35  ;;  %v425_v37 = vadd.f32 %v424_v36, %v255_v33 }
 0x132   : > { %v426_v38 = vpop.f32.mrf.mxu0 }
 0x133   : > { %430 = vst [vmem:[%s219_s29 + $0x8] sm:$0xff] %v425_v37 }
 0x134   : > { %v427_v39 = vpop.f32.mrf.mxu0 }
 0x135   : > { %768 = shalt.err (!%p765_p5)
}
 0x136   : > { %s769_s11 = scalar_lea.hbm %s1001_s5, 256  ;;  %s773_s26 = scalar_lea.hbm %s1052_s3, 512 }
 0x137   : > { %p770_p7 = scmp.ne.s32.totalorder %s1001_s5, %s769_s11  ;;  %p774_p9 = scmp.lt.s32.totalorder %s1001_s5, %s1052_s3 }
 0x138   : > { %p775_p11 = scmp.lt.s32.totalorder %s773_s26, %s769_s11 }
 0x139   : > { %p771_p6 = pnand %p770_p7, %p953_p13 }
 0x13a   : > { %p776_p12 = por %p775_p11, %p774_p9 }
 0x13b   : > { %p772_p4 = pneg %p771_p6 }
 0x13d   : > { %p777_p1 = pnand %p776_p12, %p772_p4 }
 0x13f   : > { %780 = shalt.err (!%p777_p1)
}
 0x140   : > { %594 = dma.vmem_to_hbm [thread:$0]  (%p953_p13), %s1003_s30, 256, %s1001_s5, %s432_s15  }
 0x141 PF: > { %s460_s24 = sand.u32 1, %s819_s12   ;;  %p1064_p8 = scmp.ne.s32.totalorder %s1057_s23, 0 }
 0x142   : > { %p1065_p10 = scmp.ge.s32.totalorder %s839_s17, 2  ;;  %s461_s27 = scalar_lea.sflag [#allocation4], %s460_s24 }
 0x144   : > { %p605_p0 = pnand %p1065_p10, %p1064_p8 }
 0x146   : > { %p606_p2 = pneg %p605_p0 }
 0x148   : > { %814 = dma.done.wait (%p606_p2), %s461_s27, 256  }
 0x149   : > { %816 = vsyncadd (%p606_p2), %s461_s27, 4294967040  ;;  %s20_s17 = sadd.s32 1, %s839_s17   ;;  %s1066_s12 = smov %s823_s13 }
 0x14a   : > { %p17_p3 = scmp.ge.s32.totalorder %s20_s17, 4   ;;  %s1067_s13 = smov %s827_s14 }
 0x14b   : > { %s1068_s14 = smov %s962_s19  ;;  %s1069_s15 = smov %s835_s16 }
 0x14c   : > { %s1070_s16 = smov %s1072_s28  ;;  %19 = sbr.rel (!%p17_p3) target bundleno = 7 (0x7), region = 81 }
 0x151   :  { %466 = vsyncpa [#allocation3], 1 }
 0x152   :  { %468 = vsyncpa [#allocation3 + $0x1], 1 }
 0x153   :  { %469 = vsyncpa [#allocation6], 1 }
 0x154   :  { %470 = vsyncpa [#allocation4], 1 }
 0x155   :  { %472 = vsyncpa [#allocation4 + $0x1], 1 }

</bundles_post_ra>
